<compile_context>
chip_gen: v7x
topology: tpu7x:2x2x1
jax: 0.10.0
libtpu: 0.0.40
codegen_flags: <defaults>
</compile_context>

<pallas_src>
import jax
import jax.numpy as jnp
from jax.experimental import pallas as pl
from jax.experimental.pallas import tpu as pltpu

C1 = 0.01 ** 2
C2 = 0.03 ** 2

# Number of concurrently-live full-block f32 intermediates assumed by the
# VMEM working-set model (conservative).
_LIVE_F32_BLOCKS = 12


# --------------------------------------------------------------------------- #
# Kernel
# --------------------------------------------------------------------------- #
def _make_ssim_kernel(R: int, W: int, TB: int, L: int):
    """Kernel over a (TB, L) block holding TB flattened (R x W) image planes."""
    inv9 = 1.0 / 9.0

    def kernel(cr_ref, x_ref, y_ref, o_ref):
        xv = x_ref[...].astype(jnp.float32)          # (TB, L)  f32 compute
        yv = y_ref[...].astype(jnp.float32)

        # Precomputed column / row ids (no per-step int div/mod); broadcast
        # once and reuse for every boundary select below.
        col = jnp.broadcast_to(cr_ref[0:1, :], (TB, L))
        row = jnp.broadcast_to(cr_ref[1:2, :], (TB, L))
        j_first = col == 0
        j_last = col == (W - 1)
        i_first = row == 0
        i_last = row == (R - 1)

        # Horizontal reflected neighbours -- rolled ONCE for x and y only; the
        # shifted squares / cross terms are derived from these.
        def hshift(a):
            rp = pltpu.roll(a, 1, 1)        # a[p-1]  (wrong at j==0, masked)
            rm = pltpu.roll(a, L - 1, 1)    # a[p+1]  (wrong at j==W-1, masked)
            left = jnp.where(j_first, rm, rp)    # reflect: col 0   -> col 1
            right = jnp.where(j_last, rp, rm)    # reflect: col W-1 -> col W-2
            return left, right

        lx, rx = hshift(xv)
        ly, ry = hshift(yv)

        # Vertical reflected 3-tap sum (applied to the horizontal 3-tap sums).
        def vsum(a):
            up = pltpu.roll(a, W, 1)        # a[p-W]  (wrong at i==0, masked)
            dn = pltpu.roll(a, L - W, 1)    # a[p+W]  (wrong at i==R-1, masked)
            above = jnp.where(i_first, dn, up)   # reflect: row 0   -> row 1
            below = jnp.where(i_last, up, dn)    # reflect: row R-1 -> row R-2
            return a + above + below

        mu_x = vsum(xv + lx + rx) * inv9
        mu_y = vsum(yv + ly + ry) * inv9
        mu_xx = mu_x * mu_x
        mu_yy = mu_y * mu_y
        mu_xy = mu_x * mu_y
        sigma_xy = vsum(xv * yv + lx * ly + rx * ry) * inv9 - mu_xy
        sigma_x = vsum(xv * xv + lx * lx + rx * rx) * inv9 - mu_xx
        sigma_y = vsum(yv * yv + ly * ly + ry * ry) * inv9 - mu_yy

        ssim_n = (2.0 * mu_xy + C1) * (2.0 * sigma_xy + C2)
        ssim_d = (mu_xx + mu_yy + C1) * (sigma_x + sigma_y + C2)
        # Reciprocal on the (idle) EUP instead of a VPU divide sequence.
        out = jnp.clip((1.0 - ssim_n * pl.reciprocal(ssim_d, approx=False)) * 0.5,
                       0.0, 1.0)
        o_ref[...] = out.astype(o_ref.dtype)

    return kernel


# --------------------------------------------------------------------------- #
# Planning helpers (VMEM-aware block sizing)
# --------------------------------------------------------------------------- #
def _vmem_limit_bytes() -> int:
    """Scoped-VMEM limit: half of physical VMEM, capped at 64 MiB.
    -> 64 MiB on v5e/v6e (128 MiB physical), 32 MiB on v7x (64 MiB physical)."""
    phys = 64 * 1024 * 1024                      # conservative default
    try:
        phys = int(pltpu.get_tpu_info().vmem_capacity_bytes)
    except Exception:
        pass
    return max(16 * 1024 * 1024, min(phys // 2, 64 * 1024 * 1024))


def _step_bytes(tb: int, L: int, itemsize: int) -> int:
    """Estimated VMEM working set of one grid step for a (tb, L) block:
    (8,128)-padded tiles, double-buffered 2 inputs + 1 output, plus live f32
    intermediates."""
    tb_p = ((tb + 7) // 8) * 8
    L_p = ((L + 127) // 128) * 128
    blk = tb_p * L_p
    return blk * (6 * itemsize + _LIVE_F32_BLOCKS * 4)


def _conforming_tbs(nc: int):
    """Plane-batch sizes that divide N*C and keep the (TB, L) block sublane-legal
    (multiple of 8, or the full extent)."""
    return [d for d in range(1, nc + 1) if nc % d == 0 and (d % 8 == 0 or d == nc)]


def _choose_tb(nc: int, L: int, itemsize: int, budget: int):
    """Largest legal TB whose working set fits `budget`; prefers >= 2 grid steps
    (pipelining + megacore on v7x).  Returns None if nothing fits."""
    fit = [d for d in _conforming_tbs(nc) if _step_bytes(d, L, itemsize) <= budget]
    if not fit:
        return None
    multi = [d for d in fit if nc // d >= 2]
    return max(multi) if multi else max(fit)


# --------------------------------------------------------------------------- #
# Wrapper
# --------------------------------------------------------------------------- #
def _ssim_call(x2, y2, rows: int, W: int, tb: int, vmem_limit: int):
    """One pallas_call over (NC, rows*W) flattened planes, TB planes per step."""
    NC, L = x2.shape
    lane = jnp.arange(L, dtype=jnp.int32)
    colrow = jnp.stack([lane % W, lane // W])        # (2, L) int32, DMA'd once

    return pl.pallas_call(
        _make_ssim_kernel(rows, W, tb, L),
        out_shape=jax.ShapeDtypeStruct((NC, L), x2.dtype),
        grid_spec=pltpu.PrefetchScalarGridSpec(
            num_scalar_prefetch=0,
            grid=(NC // tb,),
            in_specs=[
                # Constant block index -> fetched once, stays VMEM-resident.
                pl.BlockSpec((2, L), lambda i: (0, 0)),
                pl.BlockSpec((tb, L), lambda i: (i, 0)),
                pl.BlockSpec((tb, L), lambda i: (i, 0)),
            ],
            out_specs=pl.BlockSpec((tb, L), lambda i: (i, 0)),
        ),
        compiler_params=pltpu.CompilerParams(
            dimension_semantics=("parallel",),       # megacore-shardable on v7x
            vmem_limit_bytes=vmem_limit,
        ),
    )(colrow, x2, y2)


def ssim_loss(x: jax.Array, y: jax.Array, *, max_step_bytes=None) -> jax.Array:
    """SSIM loss, (N, C, H, W) -> (N, C, H, W), matching the PyTorch module."""
    assert x.shape == y.shape and x.ndim == 4
    N, C, H, W = x.shape
    assert H >= 2 and W >= 2, "ReflectionPad2d(1) requires H >= 2 and W >= 2"
    NC, L = N * C, H * W
    itemsize = jnp.dtype(x.dtype).itemsize

    vmem_limit = _vmem_limit_bytes()
    budget = int(vmem_limit * 0.7) if max_step_bytes is None else int(max_step_bytes)

    # ---- Fast path: whole planes fit comfortably in VMEM. ---------------- #
    tb = _choose_tb(NC, L, itemsize, budget)
    if tb is not None:
        out = _ssim_call(x.reshape(NC, L), y.reshape(NC, L), H, W, tb, vmem_limit)
        return out.reshape(N, C, H, W)

    # ---- Fallback: huge planes / tiny N*C.  Tile along image rows with a
    # 1-row halo of real neighbour rows; halo rows are dropped afterwards, so
    # interior chunk boundaries never see reflection. --------------------- #
    min_tb = min(_conforming_tbs(NC))
    TH = 1
    for th in range(H - 2, 0, -1):
        if _step_bytes(min_tb, (th + 2) * W, itemsize) <= budget:
            TH = th
            break

    pieces = []
    r0 = 0
    while r0 < H:
        out_rows = min(TH, H - r0)
        top = max(r0 - 1, 0)
        bot = min(r0 + out_rows + 1, H)
        slab_rows = bot - top
        s = r0 - top                      # halo rows at the top of the slab
        xs = x[:, :, top:bot, :].reshape(NC, slab_rows * W)
        ys = y[:, :, top:bot, :].reshape(NC, slab_rows * W)
        tb_c = _choose_tb(NC, slab_rows * W, itemsize, budget) or min_tb
        o = _ssim_call(xs, ys, slab_rows, W, tb_c, vmem_limit)
        # Halo rows got slab-edge "reflection" inside the kernel; they are not
        # real outputs -> drop them.
        pieces.append(o.reshape(NC, slab_rows, W)[:, s:s + out_rows, :])
        r0 += out_rows
    return jnp.concatenate(pieces, axis=1).reshape(N, C, H, W)


# --------------------------------------------------------------------------- #
# Pure-JAX reference (mirrors the PyTorch module) for validation
# --------------------------------------------------------------------------- #
def _ssim_ref(x, y):
    xp = jnp.pad(x, ((0, 0), (0, 0), (1, 1), (1, 1)), mode="reflect")
    yp = jnp.pad(y, ((0, 0), (0, 0), (1, 1), (1, 1)), mode="reflect")
    H, W = x.shape[-2], x.shape[-1]

    def pool3(a):
        s = jnp.zeros_like(a[..., 0:H, 0:W])
        for di in range(3):
            for dj in range(3):
                s = s + a[..., di:di + H, dj:dj + W]
        return s / 9.0

    mu_x = pool3(xp)
    mu_y = pool3(yp)
    sigma_x = pool3(xp * xp) - mu_x ** 2
    sigma_y = pool3(yp * yp) - mu_y ** 2
    sigma_xy = pool3(xp * yp) - mu_x * mu_y
    ssim_n = (2 * mu_x * mu_y + C1) * (2 * sigma_xy + C2)
    ssim_d = (mu_x ** 2 + mu_y ** 2 + C1) * (sigma_x + sigma_y + C2)
    return jnp.clip((1 - ssim_n / ssim_d) / 2, 0.0, 1.0)


if __name__ == "__main__":
    key = jax.random.PRNGKey(0)
    kx, ky = jax.random.split(key)

    # Test 1: standard path (single pallas_call, plane-batched grid).
    N, C, H, W = 2, 4, 16, 16
    x = jax.random.uniform(kx, (N, C, H, W), dtype=jnp.float32)
    y = jax.random.uniform(ky, (N, C, H, W), dtype=jnp.float32)
    out = jax.block_until_ready(ssim_loss(x, y))
    ref = jax.block_until_ready(_ssim_ref(x, y))
    assert out.shape == (N, C, H, W)
    assert jnp.allclose(out, ref, atol=2e-5, rtol=2e-5), "mismatch (main path)"

    # Test 2: row-chunked fallback path, forced via an artificially small budget.
    N2, C2, H2, W2 = 1, 2, 32, 128
    x2 = jax.random.uniform(kx, (N2, C2, H2, W2), dtype=jnp.float32)
    y2 = jax.random.uniform(ky, (N2, C2, H2, W2), dtype=jnp.float32)
    out2 = jax.block_until_ready(ssim_loss(x2, y2, max_step_bytes=2 << 20))
    ref2 = jax.block_until_ready(_ssim_ref(x2, y2))
    assert jnp.allclose(out2, ref2, atol=2e-5, rtol=2e-5), "mismatch (chunked path)"

    print("KERNEL_OK")
</pallas_src>

<mosaic_0001>
module attributes {stable_mosaic.version = 11 : i64} {
  func.func @kernel(%arg0: i32, %arg1: memref<2x256xi32, #tpu.memory_space<vmem>>, %arg2: memref<8x256xf32, #tpu.memory_space<vmem>>, %arg3: memref<8x256xf32, #tpu.memory_space<vmem>>, %arg4: memref<8x256xf32, #tpu.memory_space<vmem>>) attributes {dimension_semantics = [#tpu.dimension_semantics<parallel>], iteration_bounds = array<i64: 1>, scalar_prefetch = 0 : i64, scratch_operands = 0 : i64, tpu.core_type = #tpu.core_type<tc>, window_params = [{pipeline_mode = #tpu.pipeline_mode<synchronous>, transform_indices = @transform_0, window_bounds = array<i64: 2, 256>}, {transform_indices = @transform_1, window_bounds = array<i64: 8, 256>}, {transform_indices = @transform_2, window_bounds = array<i64: 8, 256>}, {transform_indices = @transform_3, window_bounds = array<i64: 8, 256>}]} {
    %c0 = arith.constant 0 : index
    %c0_0 = arith.constant 0 : index
    %0 = vector.load %arg2[%c0, %c0_0] : memref<8x256xf32, #tpu.memory_space<vmem>>, vector<8x256xf32>
    %c0_1 = arith.constant 0 : index
    %c0_2 = arith.constant 0 : index
    %1 = vector.load %arg3[%c0_1, %c0_2] : memref<8x256xf32, #tpu.memory_space<vmem>>, vector<8x256xf32>
    %c0_3 = arith.constant 0 : index
    %c0_4 = arith.constant 0 : index
    %2 = vector.load %arg1[%c0_3, %c0_4] : memref<2x256xi32, #tpu.memory_space<vmem>>, vector<1x256xi32>
    %3 = vector.shape_cast %2 : vector<1x256xi32> to vector<1x256xi32>
    %4 = vector.broadcast %3 : vector<1x256xi32> to vector<8x256xi32>
    %c1 = arith.constant 1 : index
    %c0_5 = arith.constant 0 : index
    %5 = vector.load %arg1[%c1, %c0_5] : memref<2x256xi32, #tpu.memory_space<vmem>>, vector<1x256xi32>
    %6 = vector.shape_cast %5 : vector<1x256xi32> to vector<1x256xi32>
    %7 = vector.broadcast %6 : vector<1x256xi32> to vector<8x256xi32>
    %c0_i32 = arith.constant 0 : i32
    %8 = vector.broadcast %c0_i32 : i32 to vector<8x256xi32>
    %9 = arith.cmpi eq, %4, %8 : vector<8x256xi32>
    %c15_i32 = arith.constant 15 : i32
    %10 = vector.broadcast %c15_i32 : i32 to vector<8x256xi32>
    %11 = arith.cmpi eq, %4, %10 : vector<8x256xi32>
    %c0_i32_6 = arith.constant 0 : i32
    %12 = vector.broadcast %c0_i32_6 : i32 to vector<8x256xi32>
    %13 = arith.cmpi eq, %7, %12 : vector<8x256xi32>
    %c15_i32_7 = arith.constant 15 : i32
    %14 = vector.broadcast %c15_i32_7 : i32 to vector<8x256xi32>
    %15 = arith.cmpi eq, %7, %14 : vector<8x256xi32>
    %c1_i32 = arith.constant 1 : i32
    %16 = tpu.dynamic_rotate %0 by %c1_i32 dim 1 : vector<8x256xf32>, i32 -> vector<8x256xf32>
    %c255_i32 = arith.constant 255 : i32
    %17 = tpu.dynamic_rotate %0 by %c255_i32 dim 1 : vector<8x256xf32>, i32 -> vector<8x256xf32>
    %18 = arith.select %9, %17, %16 : vector<8x256xi1>, vector<8x256xf32>
    %19 = arith.select %11, %16, %17 : vector<8x256xi1>, vector<8x256xf32>
    %c1_i32_8 = arith.constant 1 : i32
    %20 = tpu.dynamic_rotate %1 by %c1_i32_8 dim 1 : vector<8x256xf32>, i32 -> vector<8x256xf32>
    %c255_i32_9 = arith.constant 255 : i32
    %21 = tpu.dynamic_rotate %1 by %c255_i32_9 dim 1 : vector<8x256xf32>, i32 -> vector<8x256xf32>
    %22 = arith.select %9, %21, %20 : vector<8x256xi1>, vector<8x256xf32>
    %23 = arith.select %11, %20, %21 : vector<8x256xi1>, vector<8x256xf32>
    %24 = arith.addf %0, %18 : vector<8x256xf32>
    %25 = arith.addf %24, %19 : vector<8x256xf32>
    %c16_i32 = arith.constant 16 : i32
    %26 = tpu.dynamic_rotate %25 by %c16_i32 dim 1 : vector<8x256xf32>, i32 -> vector<8x256xf32>
    %c240_i32 = arith.constant 240 : i32
    %27 = tpu.dynamic_rotate %25 by %c240_i32 dim 1 : vector<8x256xf32>, i32 -> vector<8x256xf32>
    %28 = arith.select %13, %27, %26 : vector<8x256xi1>, vector<8x256xf32>
    %29 = arith.select %15, %26, %27 : vector<8x256xi1>, vector<8x256xf32>
    %30 = arith.addf %25, %28 : vector<8x256xf32>
    %31 = arith.addf %30, %29 : vector<8x256xf32>
    %cst = arith.constant 0.111111112 : f32
    %32 = vector.broadcast %cst : f32 to vector<8x256xf32>
    %33 = arith.mulf %31, %32 : vector<8x256xf32>
    %34 = arith.addf %1, %22 : vector<8x256xf32>
    %35 = arith.addf %34, %23 : vector<8x256xf32>
    %c16_i32_10 = arith.constant 16 : i32
    %36 = tpu.dynamic_rotate %35 by %c16_i32_10 dim 1 : vector<8x256xf32>, i32 -> vector<8x256xf32>
    %c240_i32_11 = arith.constant 240 : i32
    %37 = tpu.dynamic_rotate %35 by %c240_i32_11 dim 1 : vector<8x256xf32>, i32 -> vector<8x256xf32>
    %38 = arith.select %13, %37, %36 : vector<8x256xi1>, vector<8x256xf32>
    %39 = arith.select %15, %36, %37 : vector<8x256xi1>, vector<8x256xf32>
    %40 = arith.addf %35, %38 : vector<8x256xf32>
    %41 = arith.addf %40, %39 : vector<8x256xf32>
    %cst_12 = arith.constant 0.111111112 : f32
    %42 = vector.broadcast %cst_12 : f32 to vector<8x256xf32>
    %43 = arith.mulf %41, %42 : vector<8x256xf32>
    %44 = arith.mulf %33, %33 : vector<8x256xf32>
    %45 = arith.mulf %43, %43 : vector<8x256xf32>
    %46 = arith.mulf %33, %43 : vector<8x256xf32>
    %47 = arith.mulf %0, %1 : vector<8x256xf32>
    %48 = arith.mulf %18, %22 : vector<8x256xf32>
    %49 = arith.addf %47, %48 : vector<8x256xf32>
    %50 = arith.mulf %19, %23 : vector<8x256xf32>
    %51 = arith.addf %49, %50 : vector<8x256xf32>
    %c16_i32_13 = arith.constant 16 : i32
    %52 = tpu.dynamic_rotate %51 by %c16_i32_13 dim 1 : vector<8x256xf32>, i32 -> vector<8x256xf32>
    %c240_i32_14 = arith.constant 240 : i32
    %53 = tpu.dynamic_rotate %51 by %c240_i32_14 dim 1 : vector<8x256xf32>, i32 -> vector<8x256xf32>
    %54 = arith.select %13, %53, %52 : vector<8x256xi1>, vector<8x256xf32>
    %55 = arith.select %15, %52, %53 : vector<8x256xi1>, vector<8x256xf32>
    %56 = arith.addf %51, %54 : vector<8x256xf32>
    %57 = arith.addf %56, %55 : vector<8x256xf32>
    %cst_15 = arith.constant 0.111111112 : f32
    %58 = vector.broadcast %cst_15 : f32 to vector<8x256xf32>
    %59 = arith.mulf %57, %58 : vector<8x256xf32>
    %60 = arith.subf %59, %46 : vector<8x256xf32>
    %61 = arith.mulf %0, %0 : vector<8x256xf32>
    %62 = arith.mulf %18, %18 : vector<8x256xf32>
    %63 = arith.addf %61, %62 : vector<8x256xf32>
    %64 = arith.mulf %19, %19 : vector<8x256xf32>
    %65 = arith.addf %63, %64 : vector<8x256xf32>
    %c16_i32_16 = arith.constant 16 : i32
    %66 = tpu.dynamic_rotate %65 by %c16_i32_16 dim 1 : vector<8x256xf32>, i32 -> vector<8x256xf32>
    %c240_i32_17 = arith.constant 240 : i32
    %67 = tpu.dynamic_rotate %65 by %c240_i32_17 dim 1 : vector<8x256xf32>, i32 -> vector<8x256xf32>
    %68 = arith.select %13, %67, %66 : vector<8x256xi1>, vector<8x256xf32>
    %69 = arith.select %15, %66, %67 : vector<8x256xi1>, vector<8x256xf32>
    %70 = arith.addf %65, %68 : vector<8x256xf32>
    %71 = arith.addf %70, %69 : vector<8x256xf32>
    %cst_18 = arith.constant 0.111111112 : f32
    %72 = vector.broadcast %cst_18 : f32 to vector<8x256xf32>
    %73 = arith.mulf %71, %72 : vector<8x256xf32>
    %74 = arith.subf %73, %44 : vector<8x256xf32>
    %75 = arith.mulf %1, %1 : vector<8x256xf32>
    %76 = arith.mulf %22, %22 : vector<8x256xf32>
    %77 = arith.addf %75, %76 : vector<8x256xf32>
    %78 = arith.mulf %23, %23 : vector<8x256xf32>
    %79 = arith.addf %77, %78 : vector<8x256xf32>
    %c16_i32_19 = arith.constant 16 : i32
    %80 = tpu.dynamic_rotate %79 by %c16_i32_19 dim 1 : vector<8x256xf32>, i32 -> vector<8x256xf32>
    %c240_i32_20 = arith.constant 240 : i32
    %81 = tpu.dynamic_rotate %79 by %c240_i32_20 dim 1 : vector<8x256xf32>, i32 -> vector<8x256xf32>
    %82 = arith.select %13, %81, %80 : vector<8x256xi1>, vector<8x256xf32>
    %83 = arith.select %15, %80, %81 : vector<8x256xi1>, vector<8x256xf32>
    %84 = arith.addf %79, %82 : vector<8x256xf32>
    %85 = arith.addf %84, %83 : vector<8x256xf32>
    %cst_21 = arith.constant 0.111111112 : f32
    %86 = vector.broadcast %cst_21 : f32 to vector<8x256xf32>
    %87 = arith.mulf %85, %86 : vector<8x256xf32>
    %88 = arith.subf %87, %45 : vector<8x256xf32>
    %cst_22 = arith.constant 2.000000e+00 : f32
    %89 = vector.broadcast %cst_22 : f32 to vector<8x256xf32>
    %90 = arith.mulf %89, %46 : vector<8x256xf32>
    %cst_23 = arith.constant 9.99999974E-5 : f32
    %91 = vector.broadcast %cst_23 : f32 to vector<8x256xf32>
    %92 = arith.addf %90, %91 : vector<8x256xf32>
    %cst_24 = arith.constant 2.000000e+00 : f32
    %93 = vector.broadcast %cst_24 : f32 to vector<8x256xf32>
    %94 = arith.mulf %93, %60 : vector<8x256xf32>
    %cst_25 = arith.constant 8.99999984E-4 : f32
    %95 = vector.broadcast %cst_25 : f32 to vector<8x256xf32>
    %96 = arith.addf %94, %95 : vector<8x256xf32>
    %97 = arith.mulf %92, %96 : vector<8x256xf32>
    %98 = arith.addf %44, %45 : vector<8x256xf32>
    %cst_26 = arith.constant 9.99999974E-5 : f32
    %99 = vector.broadcast %cst_26 : f32 to vector<8x256xf32>
    %100 = arith.addf %98, %99 : vector<8x256xf32>
    %101 = arith.addf %74, %88 : vector<8x256xf32>
    %cst_27 = arith.constant 8.99999984E-4 : f32
    %102 = vector.broadcast %cst_27 : f32 to vector<8x256xf32>
    %103 = arith.addf %101, %102 : vector<8x256xf32>
    %104 = arith.mulf %100, %103 : vector<8x256xf32>
    %105 = tpu.reciprocal %104 : vector<8x256xf32> -> vector<8x256xf32>
    %106 = arith.mulf %97, %105 : vector<8x256xf32>
    %cst_28 = arith.constant 1.000000e+00 : f32
    %107 = vector.broadcast %cst_28 : f32 to vector<8x256xf32>
    %108 = arith.subf %107, %106 : vector<8x256xf32>
    %cst_29 = arith.constant 5.000000e-01 : f32
    %109 = vector.broadcast %cst_29 : f32 to vector<8x256xf32>
    %110 = arith.mulf %108, %109 : vector<8x256xf32>
    %cst_30 = arith.constant 0.000000e+00 : f32
    %cst_31 = arith.constant 1.000000e+00 : f32
    %111 = vector.broadcast %cst_30 : f32 to vector<8x256xf32>
    %112 = arith.maximumf %111, %110 : vector<8x256xf32>
    %113 = vector.broadcast %cst_31 : f32 to vector<8x256xf32>
    %114 = arith.minimumf %113, %112 : vector<8x256xf32>
    %c0_32 = arith.constant 0 : index
    %c0_33 = arith.constant 0 : index
    %115 = vector.load %arg4[%c0_32, %c0_33] : memref<8x256xf32, #tpu.memory_space<vmem>>, vector<8x256xf32>
    tpu.vector_store %arg4[%c0_32, %c0_33], %114 {strides = array<i32>} : memref<8x256xf32, #tpu.memory_space<vmem>>, vector<8x256xf32>,
    return
  }
  func.func @transform_0(%arg0: i32) -> (i32, i32) {
    %c0_i32 = arith.constant 0 : i32
    %c0_i32_0 = arith.constant 0 : i32
    %c0_i32_1 = arith.constant 0 : i32
    return %c0_i32, %c0_i32_0 : i32, i32
  }
  func.func @transform_1(%arg0: i32) -> (i32, i32) {
    %c0_i32 = arith.constant 0 : i32
    %c0_i32_0 = arith.constant 0 : i32
    return %arg0, %c0_i32 : i32, i32
  }
  func.func @transform_2(%arg0: i32) -> (i32, i32) {
    %c0_i32 = arith.constant 0 : i32
    %c0_i32_0 = arith.constant 0 : i32
    return %arg0, %c0_i32 : i32, i32
  }
  func.func @transform_3(%arg0: i32) -> (i32, i32) {
    %c0_i32 = arith.constant 0 : i32
    %c0_i32_0 = arith.constant 0 : i32
    return %arg0, %c0_i32 : i32, i32
  }
}

</mosaic_0001>

<bundles_post_ra>
// kernel: tpu_custom_call.1
= control target key start
LH: loop header
LB: loop body
LE: loop exit
PB: predicated region body
PF: predicated region fallthrough
CT: control target
= control target key end

     0   :  { %8 = vsyncpa [#allocation3], 0  ;;  %s755_s0 = inlined_call_operand.hbm [shape: s32[2,256], index: 0, kind: input, shape index: {}]   ;;  %s756_s1 = inlined_call_operand.hbm [shape: f32[8,256], index: 1, kind: input, shape index: {}]   ;;  %s757_s2 = inlined_call_operand.hbm [shape: f32[8,256], index: 2, kind: input, shape index: {}]   ;;  %s758_s3 = inlined_call_operand.hbm [shape: f32[8,256], index: 3, kind: output, shape index: {}]  }
   0x1   :  { %9 = vsyncpa [#allocation6], 0 }
   0x2   :  { %10 = vsyncpa [#allocation4], 0  ;;  %s435_s12 = smov [#allocation5]   ;;  %s436_s14 = smov [#allocation2]  }
   0x3   :  { %s27_s13 = sshll.u32 %s435_s12, 4  ;;  %s17_s15 = sshll.u32 %s436_s14, 4  ;;  %s28_s13 = int_to_ptr.vmem [resolvable:$true] %s27_s13  ;;  %s18_s15 = int_to_ptr.vmem [resolvable:$true] %s17_s15 }
   0x4   :  { %s341_s18 = scalar_lea.hbm %s756_s1, 256 }
   0x5   :  { %p342_p0 = scmp.ne.s32.totalorder %s756_s1, %s341_s18  ;;  %p345_p1 = scmp.lt.u32.totalorder %s341_s18, %s756_s1 }
   0x7   :  { %p347_p2 = pnand %p345_p1, %p342_p0 }
   0x9   :  { %350 = shalt.err (!%p347_p2)
}
   0xa   :  { %s351_s23 = scalar_lea.vmem %s28_s13, 256  ;;  %p356_p4 = scmp.lt.s32.totalorder %s28_s13, %s28_s13 }
   0xb   :  { %p352_p3 = scmp.ne.s32.totalorder %s28_s13, %s351_s23  ;;  %p357_p5 = scmp.lt.s32.totalorder %s351_s23, %s351_s23 }
   0xd   :  { %p358_p6 = por %p357_p5, %p356_p4 }
   0xf   :  { %p359_p7 = pnand %p358_p6, %p352_p3 }
  0x11   :  { %362 = shalt.err (!%p359_p7)
}
  0x12   :  { %30 = dma.hbm_to_vmem [thread:$0]  %s756_s1, 256, %s28_s13, [#allocation6]  }
  0x13   :  { %s363_s28 = scalar_lea.hbm %s755_s0, 64 }
  0x14   :  { %p364_p8 = scmp.ne.s32.totalorder %s755_s0, %s363_s28  ;;  %p367_p9 = scmp.lt.u32.totalorder %s363_s28, %s755_s0 }
  0x16   :  { %p369_p10 = pnand %p367_p9, %p364_p8 }
  0x18   :  { %372 = shalt.err (!%p369_p10)
}
  0x19   :  { %s373_s6 = scalar_lea.vmem %s18_s15, 64  ;;  %p378_p12 = scmp.lt.s32.totalorder %s18_s15, %s18_s15 }
  0x1a   :  { %p374_p11 = scmp.ne.s32.totalorder %s18_s15, %s373_s6  ;;  %p379_p13 = scmp.lt.s32.totalorder %s373_s6, %s373_s6 }
  0x1c   :  { %p380_p0 = por %p379_p13, %p378_p12 }
  0x1e   :  { %p381_p1 = pnand %p380_p0, %p374_p11 }
  0x20   :  { %384 = shalt.err (!%p381_p1)
}
  0x21   :  { %20 = dma.hbm_to_vmem [thread:$0]  %s755_s0, 64, %s18_s15, [#allocation3]  }
  0x22   :  { %s437_s8 = smov [#allocation7]   ;;  %s385_s12 = scalar_lea.hbm %s757_s2, 256 }
  0x23   :  { %s37_s9 = sshll.u32 %s437_s8, 4  ;;  %p386_p2 = scmp.ne.s32.totalorder %s757_s2, %s385_s12  ;;  %s38_s9 = int_to_ptr.vmem [resolvable:$true] %s37_s9 }
  0x24   :  { %p389_p3 = scmp.lt.u32.totalorder %s385_s12, %s757_s2 }
  0x26   :  { %p391_p4 = pnand %p389_p3, %p386_p2 }
  0x28   :  { %394 = shalt.err (!%p391_p4)
}
  0x29   :  { %s395_s18 = scalar_lea.vmem %s38_s9, 256  ;;  %p400_p6 = scmp.lt.s32.totalorder %s38_s9, %s38_s9 }
  0x2a   :  { %p396_p5 = scmp.ne.s32.totalorder %s38_s9, %s395_s18  ;;  %p401_p7 = scmp.lt.s32.totalorder %s395_s18, %s395_s18 }
  0x2c   :  { %p402_p8 = por %p401_p7, %p400_p6 }
  0x2e   :  { %p403_p9 = pnand %p402_p8, %p396_p5 }
  0x30   :  { %406 = shalt.err (!%p403_p9)
}
  0x31   :  { %40 = dma.hbm_to_vmem [thread:$0]  %s757_s2, 256, %s38_s9, [#allocation6]  }
  0x32   :  { %429 = dma.done.wait [#allocation3], 64  }
  0x33   :  { %430 = vsyncadd [#allocation3], 4294967232 }
  0x34   :  { %431 = dma.done.wait [#allocation6], 512  }
  0x35   :  { %432 = vsyncadd [#allocation6], 4294966784  ;;  %v499_v0 = vld [vmem:[#allocation5] sm:$0xff]  ;;  %s438_s19 = smov 127   ;;  %s439_s20 = smov 1   ;;  %v503_v1 = vld [vmem:[#allocation5 + $0x8] sm:$0xff]  ;;  %v55_v4 = vlaneseq }
  0x36   :  { %90 = vrot.lane.b32.xlu1 %v499_v0, %s438_s19  ;;  %81 = vrot.lane.b32.xlu0 %v499_v0, %s439_s20  ;;  %v507_v2 = vld [vmem:[#allocation7 + $0x8] sm:$0xff]  ;;  %v509_v3 = vld [vmem:[#allocation7] sm:$0xff]  ;;  %s440_s2 = smov 16   ;;  %s441_s21 = smov 112   ;;  %v212_v42 = vmul.f32 %v503_v1, %v503_v1  ;;  %v211_v43 = vmul.f32 %v499_v0, %v499_v0 }
  0x37   :  { %v515_v5 = vshrl.u32 %v55_v4, 7  ;;  %v54_v8 = vld [vmem:[#allocation2] ss:$2 sm:$0x3]  ;;  %v519_v9 = vand.u32 127, %v55_v4  ;;  %v246_v52 = vmul.f32 %v507_v2, %v507_v2  ;;  %v245_v53 = vmul.f32 %v509_v3, %v509_v3  ;;  %s442_s22 = smov [#allocation8]  }
  0x38   :  { %v178_v62 = vmul.f32 %v507_v2, %v503_v1  ;;  %v177_v63 = vmul.f32 %v509_v3, %v499_v0  ;;  %s319_s23 = sshll.u32 %s442_s22, 4  ;;  %s320_s23 = int_to_ptr.vmem [resolvable:$true] %s319_s23 }
  0x39   :  { %v57_v6 = vsub.s32 0, %v515_v5  ;;  %v61_v7 = vsub.s32 1, %v515_v5  ;;  %vm94_vm0 = vcmp.lt.s32.totalorder %v519_v9, 127  ;;  %vm87_vm1 = vcmp.lt.s32.totalorder %v519_v9, 1  ;;  %s407_s24 = scalar_lea.vmem %s320_s23, 256  ;;  %p412_p11 = scmp.lt.s32.totalorder %s320_s23, %s320_s23 }
  0x3a   :  { %92 = vrot.lane.b32.xlu1 %v503_v1, %s438_s19  ;;  %83 = vrot.lane.b32.xlu0 %v503_v1, %s439_s20  ;;  %vm132_vm6 = vcmp.lt.s32.totalorder %v519_v9, 112  ;;  %vm125_vm7 = vcmp.lt.s32.totalorder %v519_v9, 16  ;;  %p408_p10 = scmp.ne.s32.totalorder %s320_s23, %s407_s24  ;;  %p413_p12 = scmp.lt.s32.totalorder %s407_s24, %s407_s24 }
  0x3b   :  { %v58_v10 = vrot.slane %v54_v8, %v57_v6  ;;  %v62_v11 = vrot.slane %v54_v8, %v61_v7 }
  0x3c   :  { %p414_p13 = por %p413_p12, %p412_p11 }
  0x3d   :  { %vm73_vm2 = vcmp.eq.s32.totalorder %v58_v10, 0  ;;  %vm74_vm3 = vcmp.eq.s32.totalorder %v62_v11, 0  ;;  %vm75_vm4 = vcmp.eq.s32.totalorder %v58_v10, 15  ;;  %vm76_vm5 = vcmp.eq.s32.totalorder %v62_v11, 15 }
  0x3e   :  { %103 = vrot.lane.b32.xlu1 %v507_v2, %s439_s20  ;;  %101 = vrot.lane.b32.xlu0 %v509_v3, %s439_s20  ;;  %p415_p0 = pnand %p414_p13, %p408_p10 }
  0x42   :  { %109 = vrot.lane.b32.xlu1 %v507_v2, %s438_s19  ;;  %107 = vrot.lane.b32.xlu0 %v509_v3, %s438_s19 }
  0xa8   :  { %v91_v12 = vpop.permute.xlu1 %90  ;;  %v82_v13 = vpop.permute.xlu0 %81 }
  0xac   :  { %v93_v14 = vpop.permute.xlu1 %92  ;;  %v84_v15 = vpop.permute.xlu0 %83 }
  0xad   :  { %v95_v16 = vsel %vm94_vm0, %v91_v12, %v93_v14  ;;  %v96_v17 = vsel %vm94_vm0, %v93_v14, %v91_v12  ;;  %v88_v18 = vsel %vm87_vm1, %v82_v13, %v84_v15  ;;  %v89_v19 = vsel %vm87_vm1, %v84_v15, %v82_v13 }
  0xae   :  { %v97_v20 = vsel %vm73_vm2, %v95_v16, %v89_v19  ;;  %v98_v21 = vsel %vm74_vm3, %v96_v17, %v88_v18  ;;  %v540_v24 = vsel %vm75_vm4, %v89_v19, %v95_v16  ;;  %v543_v25 = vsel %vm76_vm5, %v88_v18, %v96_v17  ;;  %v64_v18 = vld [vmem:[#allocation2 + $0x1] ss:$2 sm:$0x3] }
  0xaf   :  { %v117_v22 = vadd.f32 %v97_v20, %v499_v0  ;;  %v118_v23 = vadd.f32 %v98_v21, %v503_v1  ;;  %v213_v44 = vmul.f32 %v97_v20, %v97_v20  ;;  %v214_v45 = vmul.f32 %v98_v21, %v98_v21 }
  0xb0   :  { %v104_v26 = vpop.permute.xlu1 %103  ;;  %v102_v27 = vpop.permute.xlu0 %101  ;;  %v218_v50 = vmul.f32 %v543_v25, %v543_v25  ;;  %v217_v51 = vmul.f32 %v540_v24, %v540_v24 }
  0xb1   :  { %v546_v28 = vadd.f32 %v117_v22, %v540_v24  ;;  %v549_v29 = vadd.f32 %v118_v23, %v543_v25  ;;  %v105_v32 = vsel %vm87_vm1, %v102_v27, %v104_v26  ;;  %v106_v33 = vsel %vm87_vm1, %v104_v26, %v102_v27 }
  0xb2   :  { %v216_v48 = vadd.f32 %v214_v45, %v212_v42  ;;  %v215_v49 = vadd.f32 %v213_v44, %v211_v43  ;;  %v645_v22 = vrot.slane %v64_v18, %v61_v7 }
  0xb3   :  { %121 = vrot.lane.b32.xlu0 %v546_v28, %s440_s2  ;;  %123 = vrot.lane.b32.xlu1 %v549_v29, %s440_s2 }
  0xb4   :  { %v110_v30 = vpop.permute.xlu1 %109  ;;  %v108_v31 = vpop.permute.xlu0 %107  ;;  %v597_v56 = vadd.f32 %v218_v50, %v216_v48  ;;  %v599_v57 = vadd.f32 %v217_v51, %v215_v49  ;;  %vm78_vm9 = vcmp.eq.s32.totalorder %v645_v22, 0  ;;  %vm80_vm11 = vcmp.eq.s32.totalorder %v645_v22, 15 }
  0xb5   :  { %v111_v34 = vsel %vm94_vm0, %v108_v31, %v110_v30  ;;  %v112_v35 = vsel %vm94_vm0, %v110_v30, %v108_v31 }
  0xb6   :  { %v113_v36 = vsel %vm73_vm2, %v111_v34, %v106_v33  ;;  %v114_v37 = vsel %vm74_vm3, %v112_v35, %v105_v32  ;;  %v115_v40 = vsel %vm75_vm4, %v106_v33, %v111_v34  ;;  %v116_v41 = vsel %vm76_vm5, %v105_v32, %v112_v35 }
  0xb7   :  { %128 = vrot.lane.b32.xlu0 %v546_v28, %s441_s21  ;;  %130 = vrot.lane.b32.xlu1 %v549_v29, %s441_s21  ;;  %v146_v38 = vadd.f32 %v114_v37, %v507_v2  ;;  %v145_v39 = vadd.f32 %v113_v36, %v509_v3  ;;  %v247_v54 = vmul.f32 %v113_v36, %v113_v36 }
  0xb8   :  { %v248_v55 = vmul.f32 %v114_v37, %v114_v37  ;;  %v252_v60 = vmul.f32 %v116_v41, %v116_v41  ;;  %v251_v61 = vmul.f32 %v115_v40, %v115_v40  ;;  %v179_v4 = vmul.f32 %v113_v36, %v97_v20 }
  0xb9   :  { %v577_v46 = vadd.f32 %v146_v38, %v116_v41  ;;  %v579_v47 = vadd.f32 %v145_v39, %v115_v40  ;;  %v249_v59 = vadd.f32 %v247_v54, %v245_v53  ;;  %v180_v8 = vmul.f32 %v114_v37, %v98_v21 }
  0xba   :  { %v250_v58 = vadd.f32 %v248_v55, %v246_v52  ;;  %v181_v13 = vadd.f32 %v179_v4, %v177_v63  ;;  %v184_v0 = vmul.f32 %v116_v41, %v543_v25  ;;  %v183_v1 = vmul.f32 %v115_v40, %v540_v24 }
  0xbb   :  { %151 = vrot.lane.b32.xlu1 %v577_v46, %s440_s2  ;;  %149 = vrot.lane.b32.xlu0 %v579_v47, %s440_s2  ;;  %v615_v11 = vadd.f32 %v251_v61, %v249_v59  ;;  %v182_v12 = vadd.f32 %v180_v8, %v178_v62  ;;  %v641_v21 = vrot.slane %v64_v18, %v57_v6 }
  0xbc   :  { %v613_v10 = vadd.f32 %v252_v60, %v250_v58  ;;  %v629_v3 = vadd.f32 %v183_v1, %v181_v13 }
  0xbd   :  { %v627_v2 = vadd.f32 %v184_v0, %v182_v12  ;;  %vm77_vm8 = vcmp.eq.s32.totalorder %v641_v21, 0  ;;  %vm79_vm10 = vcmp.eq.s32.totalorder %v641_v21, 15 }
  0xbf   :  { %157 = vrot.lane.b32.xlu1 %v577_v46, %s441_s21  ;;  %155 = vrot.lane.b32.xlu0 %v579_v47, %s441_s21 }
  0xc3   :  { %223 = vrot.lane.b32.xlu1 %v597_v56, %s440_s2  ;;  %221 = vrot.lane.b32.xlu0 %v599_v57, %s440_s2 }
  0xc7   :  { %229 = vrot.lane.b32.xlu1 %v597_v56, %s441_s21  ;;  %227 = vrot.lane.b32.xlu0 %v599_v57, %s441_s21 }
  0xcb   :  { %257 = vrot.lane.b32.xlu1 %v613_v10, %s440_s2  ;;  %255 = vrot.lane.b32.xlu0 %v615_v11, %s440_s2 }
  0xcf   :  { %263 = vrot.lane.b32.xlu1 %v613_v10, %s441_s21  ;;  %261 = vrot.lane.b32.xlu0 %v615_v11, %s441_s21 }
  0xd3   :  { %189 = vrot.lane.b32.xlu1 %v627_v2, %s440_s2  ;;  %187 = vrot.lane.b32.xlu0 %v629_v3, %s440_s2 }
  0xd7   :  { %195 = vrot.lane.b32.xlu1 %v627_v2, %s441_s21  ;;  %193 = vrot.lane.b32.xlu0 %v629_v3, %s441_s21 }
 0x125   :  { %v124_v14 = vpop.permute.xlu1 %123  ;;  %v122_v15 = vpop.permute.xlu0 %121 }
 0x126   :  { %v126_v30 = vsel %vm125_vm7, %v122_v15, %v124_v14  ;;  %v127_v31 = vsel %vm125_vm7, %v124_v14, %v122_v15 }
 0x129   :  { %v129_v16 = vpop.permute.xlu0 %128  ;;  %v131_v17 = vpop.permute.xlu1 %130 }
 0x12a   :  { %v133_v5 = vsel %vm132_vm6, %v129_v16, %v131_v17  ;;  %v134_v6 = vsel %vm132_vm6, %v131_v17, %v129_v16 }
 0x12b   :  { %v135_v36 = vsel %vm77_vm8, %v133_v5, %v127_v31  ;;  %v136_v37 = vsel %vm78_vm9, %v134_v6, %v126_v30  ;;  %v137_v44 = vsel %vm79_vm10, %v127_v31, %v133_v5  ;;  %v138_v45 = vsel %vm80_vm11, %v126_v30, %v134_v6 }
 0x12c   :  { %v139_v40 = vadd.f32 %v135_v36, %v546_v28  ;;  %v140_v41 = vadd.f32 %v136_v37, %v549_v29 }
 0x12d   :  { %v152_v19 = vpop.permute.xlu1 %151  ;;  %v150_v20 = vpop.permute.xlu0 %149 }
 0x12e   :  { %v153_v7 = vsel %vm125_vm7, %v150_v20, %v152_v19  ;;  %v154_v27 = vsel %vm125_vm7, %v152_v19, %v150_v20  ;;  %v141_v52 = vadd.f32 %v139_v40, %v137_v44  ;;  %v142_v53 = vadd.f32 %v140_v41, %v138_v45 }
 0x130   :  { %v143_v12 = vmul.f32 0.11111111, %v141_v52  ;;  %v144_v13 = vmul.f32 0.11111111, %v142_v53 }
 0x131   :  { %v158_v23 = vpop.permute.xlu1 %157  ;;  %v156_v24 = vpop.permute.xlu0 %155 }
 0x132   :  { %v159_v25 = vsel %vm132_vm6, %v156_v24, %v158_v23  ;;  %v160_v26 = vsel %vm132_vm6, %v158_v23, %v156_v24  ;;  %v171_v31 = vmul.f32 %v143_v12, %v143_v12 }
 0x133   :  { %v161_v32 = vsel %vm77_vm8, %v159_v25, %v154_v27  ;;  %v162_v33 = vsel %vm78_vm9, %v160_v26, %v153_v7  ;;  %v163_v48 = vsel %vm79_vm10, %v154_v27, %v159_v25 }
 0x134   :  { %v165_v38 = vadd.f32 %v161_v32, %v579_v47  ;;  %v166_v39 = vadd.f32 %v162_v33, %v577_v46  ;;  %v164_v47 = vsel %vm80_vm11, %v153_v7, %v160_v26  ;;  %v172_v32 = vmul.f32 %v144_v13, %v144_v13 }
 0x135   :  { %v224_v34 = vpop.permute.xlu1 %223  ;;  %v222_v35 = vpop.permute.xlu0 %221 }
 0x136   :  { %v167_v29 = vadd.f32 %v165_v38, %v163_v48  ;;  %v168_v49 = vadd.f32 %v166_v39, %v164_v47  ;;  %v225_v50 = vsel %vm125_vm7, %v222_v35, %v224_v34  ;;  %v226_v51 = vsel %vm125_vm7, %v224_v34, %v222_v35 }
 0x138   :  { %v169_v62 = vmul.f32 0.11111111, %v167_v29  ;;  %v170_v63 = vmul.f32 0.11111111, %v168_v49 }
 0x139   :  { %v230_v42 = vpop.permute.xlu1 %229  ;;  %v228_v43 = vpop.permute.xlu0 %227 }
 0x13a   :  { %v231_v46 = vsel %vm132_vm6, %v228_v43, %v230_v42  ;;  %v232_v28 = vsel %vm132_vm6, %v230_v42, %v228_v43  ;;  %v173_v20 = vmul.f32 %v169_v62, %v169_v62  ;;  %v174_v23 = vmul.f32 %v170_v63, %v170_v63 }
 0x13b   :  { %v233_v54 = vsel %vm77_vm8, %v231_v46, %v226_v51  ;;  %v234_v55 = vsel %vm78_vm9, %v232_v28, %v225_v50  ;;  %v235_v4 = vsel %vm79_vm10, %v226_v51, %v231_v46  ;;  %v236_v8 = vsel %vm80_vm11, %v225_v50, %v232_v28 }
 0x13c   :  { %v237_v60 = vadd.f32 %v233_v54, %v599_v57  ;;  %v238_v61 = vadd.f32 %v234_v55, %v597_v56  ;;  %v289_v35 = vadd.f32 %v173_v20, %v171_v31  ;;  %v290_v36 = vadd.f32 %v174_v23, %v172_v32 }
 0x13d   :  { %v258_v58 = vpop.permute.xlu1 %257  ;;  %v256_v59 = vpop.permute.xlu0 %255 }
 0x13e   :  { %v239_v0 = vadd.f32 %v237_v60, %v235_v4  ;;  %v240_v1 = vadd.f32 %v238_v61, %v236_v8  ;;  %v259_v16 = vsel %vm125_vm7, %v256_v59, %v258_v58  ;;  %v260_v56 = vsel %vm125_vm7, %v258_v58, %v256_v59 }
 0x13f   :  { %v291_v51 = vadd.f32 0.0001, %v289_v35  ;;  %v292_v52 = vadd.f32 0.0001, %v290_v36  ;;  %v175_v60 = vmul.f32 %v169_v62, %v143_v12  ;;  %v176_v61 = vmul.f32 %v170_v63, %v144_v13 }
 0x140   :  { %v241_v26 = vmul.f32 0.11111111, %v239_v0  ;;  %v242_v5 = vmul.f32 0.11111111, %v240_v1 }
 0x141   :  { %v264_v14 = vpop.permute.xlu1 %263  ;;  %v262_v15 = vpop.permute.xlu0 %261 }
 0x142   :  { %v265_v57 = vsel %vm132_vm6, %v262_v15, %v264_v14  ;;  %v266_v17 = vsel %vm132_vm6, %v264_v14, %v262_v15  ;;  %v243_v38 = vsub.f32 %v241_v26, %v171_v31  ;;  %v279_v15 = vmul.f32 2.0, %v175_v60 }
 0x143   :  { %v267_v18 = vsel %vm77_vm8, %v265_v57, %v260_v56  ;;  %v268_v19 = vsel %vm78_vm9, %v266_v17, %v259_v16  ;;  %v269_v6 = vsel %vm79_vm10, %v260_v56, %v265_v57  ;;  %v270_v7 = vsel %vm80_vm11, %v259_v16, %v266_v17 }
 0x144   :  { %v271_v24 = vadd.f32 %v267_v18, %v615_v11  ;;  %v272_v25 = vadd.f32 %v268_v19, %v613_v10  ;;  %v244_v10 = vsub.f32 %v242_v5, %v172_v32  ;;  %v280_v16 = vmul.f32 2.0, %v176_v61 }
 0x145   :  { %v190_v27 = vpop.permute.xlu1 %189  ;;  %v188_v30 = vpop.permute.xlu0 %187  ;;  %v281_v57 = vadd.f32 0.0001, %v279_v15 }
 0x146   :  { %v273_v33 = vadd.f32 %v271_v24, %v269_v6  ;;  %v274_v34 = vadd.f32 %v272_v25, %v270_v7  ;;  %v191_v39 = vsel %vm125_vm7, %v188_v30, %v190_v27  ;;  %v192_v40 = vsel %vm125_vm7, %v190_v27, %v188_v30 }
 0x147   :  { %v282_v17 = vadd.f32 0.0001, %v280_v16 }
 0x148   :  { %v275_v37 = vmul.f32 0.11111111, %v273_v33  ;;  %v276_v11 = vmul.f32 0.11111111, %v274_v34 }
 0x149   :  { %v196_v41 = vpop.permute.xlu1 %195  ;;  %v194_v42 = vpop.permute.xlu0 %193 }
 0x14a   :  { %v277_v43 = vsub.f32 %v275_v37, %v173_v20  ;;  %v278_v44 = vsub.f32 %v276_v11, %v174_v23  ;;  %v197_v45 = vsel %vm132_vm6, %v194_v42, %v196_v41  ;;  %v198_v48 = vsel %vm132_vm6, %v196_v41, %v194_v42 }
 0x14b   :  { %v199_v47 = vsel %vm77_vm8, %v197_v45, %v192_v40  ;;  %v200_v46 = vsel %vm78_vm9, %v198_v48, %v191_v39  ;;  %v201_v53 = vsel %vm79_vm10, %v192_v40, %v197_v45  ;;  %v202_v9 = vsel %vm80_vm11, %v191_v39, %v198_v48 }
 0x14c   :  { %v293_v28 = vadd.f32 %v277_v43, %v243_v38  ;;  %v294_v29 = vadd.f32 %v278_v44, %v244_v10  ;;  %v203_v49 = vadd.f32 %v199_v47, %v629_v3  ;;  %v204_v50 = vadd.f32 %v200_v46, %v627_v2 }
 0x14e   :  { %v295_v54 = vadd.f32 0.0009, %v293_v28  ;;  %v296_v55 = vadd.f32 0.0009, %v294_v29  ;;  %v205_v58 = vadd.f32 %v203_v49, %v201_v53  ;;  %v206_v59 = vadd.f32 %v204_v50, %v202_v9 }
 0x150   :  { %v297_v4 = vmul.f32 %v295_v54, %v291_v51  ;;  %v298_v8 = vmul.f32 %v296_v55, %v292_v52  ;;  %v207_v0 = vmul.f32 0.11111111, %v205_v58  ;;  %v208_v3 = vmul.f32 0.11111111, %v206_v59 }
 0x152   :  { %337 = vrcp.f32 %v297_v4  ;;  %v209_v2 = vsub.f32 %v207_v0, %v175_v60  ;;  %v210_v1 = vsub.f32 %v208_v3, %v176_v61 }
 0x153   :  { %339 = vrcp.f32 %v298_v8 }
 0x154   :  { %v283_v14 = vmul.f32 2.0, %v209_v2  ;;  %v284_v21 = vmul.f32 2.0, %v210_v1 }
 0x156   :  { %v285_v22 = vadd.f32 0.0009, %v283_v14  ;;  %v286_v56 = vadd.f32 0.0009, %v284_v21 }
 0x158   :  { %v287_v18 = vmul.f32 %v285_v22, %v281_v57  ;;  %v288_v62 = vmul.f32 %v286_v56, %v282_v17 }
 0x15c   :  { %v338_v19 = vpop.eup %337 }
 0x15d   :  { %v340_v63 = vpop.eup %339  ;;  %v301_v12 = vmul.f32 %v338_v19, %v287_v18 }
 0x15e   :  { %v302_v13 = vmul.f32 %v340_v63, %v288_v62 }
 0x15f   :  { %v303_v20 = vsub.f32 1.0, %v301_v12 }
 0x160   :  { %v304_v23 = vsub.f32 1.0, %v302_v13 }
 0x161   :  { %v305_v24 = vmul.f32 0.5, %v303_v20 }
 0x162   :  { %v306_v25 = vmul.f32 0.5, %v304_v23 }
 0x163   :  { %v307_v26 = vmax.f32 %v305_v24, 0.0 }
 0x164   :  { %v308_v5 = vmax.f32 %v306_v25, 0.0 }
 0x165   :  { %v309_v6 = vmin.f32 %v307_v26, 1.0 }
 0x166   :  { %v310_v7 = vmin.f32 %v308_v5, 1.0 }
 0x167   :  { %311 = vst [vmem:[#allocation8] sm:$0xff] %v309_v6 }
 0x168   :  { %312 = vst [vmem:[#allocation8 + $0x8] sm:$0xff] %v310_v7 }
 0x169   :  { %418 = shalt.err (!%p415_p0)
}
 0x16a   :  { %s419_s27 = scalar_lea.hbm %s758_s3, 256 }
 0x16b   :  { %p420_p1 = scmp.ne.s32.totalorder %s758_s3, %s419_s27  ;;  %p423_p2 = scmp.lt.u32.totalorder %s419_s27, %s758_s3 }
 0x16d   :  { %p425_p3 = pnand %p423_p2, %p420_p1 }
 0x16f   :  { %428 = shalt.err (!%p425_p3)
}
 0x170   :  { %322 = dma.vmem_to_hbm [thread:$0]  %s320_s23, 256, %s758_s3, [#allocation4]  }
 0x171   :  { %433 = dma.done.wait [#allocation4], 256  }
 0x172   :  { %434 = vsyncadd [#allocation4], 4294967040 }
 0x173   :  { %326 = vsyncpa [#allocation3], 1 }
 0x174   :  { %327 = vsyncpa [#allocation6], 1 }
 0x175   :  { %328 = vsyncpa [#allocation4], 1 }

</bundles_post_ra>
